<compile_context>
chip_gen: v5e
topology: v5e:2x2
jax: 0.10.0
libtpu: 0.0.40
codegen_flags: <defaults>
</compile_context>

<pallas_src>
import functools

import jax
import jax.numpy as jnp
from jax.experimental import pallas as pl
from jax.experimental.pallas import tpu as pltpu


def _round_up(x, m):
    return (x + m - 1) // m * m


def _vmem_capacity_bytes(default=64 * 1024 * 1024):
    """Physical VMEM capacity; conservative (v7x-sized) fallback if unknown."""
    try:
        info = pltpu.get_tpu_info()
        cap = getattr(info, "vmem_capacity_bytes", None)
        if cap:
            return int(cap)
    except Exception:
        pass
    return default


def _select_tiles(Bp, Cin_p, Cout_p, op_bytes, tile_budget):
    """Pick (tn, tk, x_resident, vmem_need) under a VMEM byte budget.

    Tiles are lane-dense multiples of 128 that divide the padded dims.  tn is
    capped at Cout_p//2 when Cout_p >= 256 so the parallel axis has >= 2 blocks
    (v7x has 2 TensorCores).  Resident x (single fetch) is preferred.
    """
    def cands(total, cap):
        out = [c for c in (1024, 512, 256, 128) if c <= cap and total % c == 0]
        return out or [128]

    tn_cap = Cout_p if Cout_p < 256 else Cout_p // 2
    tn_list = cands(Cout_p, min(tn_cap, 1024))
    tk_list = cands(Cin_p, 1024)

    def need(tn, tk, resident):
        x_bytes = 2 * Bp * (Cin_p if resident else tk) * op_bytes   # double-buffered
        w_bytes = 2 * tk * tn * op_bytes
        o_bytes = 2 * Bp * tn * 4                                   # f32 output/acc
        misc = 3 * 2 * tn * 4                                       # bias/gamma/beta
        return x_bytes + w_bytes + o_bytes + misc

    for resident in (True, False):
        for tn in tn_list:
            for tk in tk_list:
                n = need(tn, tk, resident)
                if n <= tile_budget:
                    return tn, tk, resident, n
    # Last resort: smallest tiles, streamed x (may exceed budget for huge B).
    return 128, 128, False, need(128, 128, False)


def _linear_bn_relu_kernel(x_ref, w_ref, b_ref, g_ref, beta_ref, o_ref,
                           *, eps, batch, tk, x_resident):
    """Grid = (nj, nk): j tiles Cout (parallel), k tiles Cin (reduction)."""
    k = pl.program_id(1)

    @pl.when(k == 0)
    def _init():
        o_ref[...] = jnp.zeros_like(o_ref)

    if x_resident:
        xk = x_ref[:, pl.ds(pl.multiple_of(k * tk, tk), tk)]
    else:
        xk = x_ref[...]

    # MXU matmul: narrow (bf16) operands, f32 accumulation directly into o_ref
    # (output block index is constant across k, so it stays resident).
    o_ref[...] += jnp.dot(xk, w_ref[...], preferred_element_type=jnp.float32)

    @pl.when(k == pl.num_programs(1) - 1)
    def _finalize():
        y = o_ref[...] + b_ref[...]                              # [Bp, tn], f32

        # BatchNorm1d (training-mode) statistics over the true batch rows only.
        bp = y.shape[0]
        row = jax.lax.broadcasted_iota(jnp.int32, (bp, 1), 0)
        mask = row < batch
        inv_b = jnp.float32(1.0 / batch)
        mean = jnp.sum(jnp.where(mask, y, 0.0), axis=0, keepdims=True) * inv_b
        d = jnp.where(mask, y - mean, 0.0)                       # two-pass variance
        var = jnp.sum(d * d, axis=0, keepdims=True) * inv_b

        # Folded affine + ReLU: one FMA + max per element; rsqrt goes to EUP.
        a = g_ref[...] * jax.lax.rsqrt(var + jnp.float32(eps))
        c = beta_ref[...] - mean * a
        o_ref[...] = jnp.maximum(y * a + c, 0.0).astype(o_ref.dtype)


def linear_block_forward(x, w, b, gamma, beta, *, eps=1e-5,
                         compute_dtype=jnp.bfloat16):
    """x: [B, Cin]; w: [Cout, Cin] (PyTorch layout); b, gamma, beta: [Cout]."""
    B, Cin = x.shape
    Cout = w.shape[0]

    # Pad to TPU-friendly shapes: lane-dense 128 multiples; batch to 16 so bf16
    # sublane packing stays dense.
    Bp = _round_up(B, 16)
    Cin_p = _round_up(Cin, 128)
    Cout_p = _round_up(Cout, 128)

    op_bytes = jnp.dtype(compute_dtype).itemsize
    vmem_cap = _vmem_capacity_bytes()
    tile_budget = int(vmem_cap * 0.6)
    tn, tk, x_resident, vmem_need = _select_tiles(Bp, Cin_p, Cout_p, op_bytes,
                                                  tile_budget)
    nj = Cout_p // tn
    nk = Cin_p // tk
    vmem_limit = int(min(max(vmem_need + (4 << 20), 32 << 20), vmem_cap))

    # Host prep: cast first, then pad (no full-size f32 zero buffers).
    f32 = jnp.float32
    xp = jnp.pad(x.astype(compute_dtype), ((0, Bp - B), (0, Cin_p - Cin)))
    w_t = jnp.pad(w.astype(compute_dtype).T, ((0, Cin_p - Cin), (0, Cout_p - Cout)))
    b_p = jnp.pad(b.astype(f32), (0, Cout_p - Cout)).reshape(1, Cout_p)
    g_p = jnp.pad(gamma.astype(f32), (0, Cout_p - Cout)).reshape(1, Cout_p)
    be_p = jnp.pad(beta.astype(f32), (0, Cout_p - Cout)).reshape(1, Cout_p)

    kernel = functools.partial(_linear_bn_relu_kernel, eps=eps, batch=B,
                               tk=tk, x_resident=x_resident)

    if x_resident:
        x_spec = pl.BlockSpec((Bp, Cin_p), lambda j, k: (0, 0))   # one DMA, resident
    else:
        x_spec = pl.BlockSpec((Bp, tk), lambda j, k: (0, k))      # streamed fallback

    out = pl.pallas_call(
        kernel,
        out_shape=jax.ShapeDtypeStruct((Bp, Cout_p), jnp.float32),
        grid_spec=pltpu.PrefetchScalarGridSpec(
            num_scalar_prefetch=0,
            grid=(nj, nk),
            in_specs=[
                x_spec,                                           # x
                pl.BlockSpec((tk, tn), lambda j, k: (k, j)),      # w^T (weight stream)
                pl.BlockSpec((1, tn), lambda j, k: (0, j)),       # bias
                pl.BlockSpec((1, tn), lambda j, k: (0, j)),       # gamma
                pl.BlockSpec((1, tn), lambda j, k: (0, j)),       # beta
            ],
            out_specs=pl.BlockSpec((Bp, tn), lambda j, k: (0, j)),
        ),
        compiler_params=pltpu.CompilerParams(
            dimension_semantics=("parallel", "arbitrary"),
            vmem_limit_bytes=vmem_limit,
        ),
    )(xp, w_t, b_p, g_p, be_p)

    return out[:B, :Cout]


def _reference(x, w, b, gamma, beta, eps=1e-5):
    y = x @ w.T + b[None, :]
    mean = jnp.mean(y, axis=0, keepdims=True)
    var = jnp.mean((y - mean) ** 2, axis=0, keepdims=True)
    y_hat = (y - mean) / jnp.sqrt(var + eps)
    return jnp.maximum(y_hat * gamma[None, :] + beta[None, :], 0.0)


# TODO(synk): BatchNorm1d running_mean / running_var state updates are not
# produced; only the normalized forward output (training-mode) is computed.
# TODO(synk): bf16 output (to halve writeback DMA) would need a separate f32
# accumulator; output is kept f32 to match PyTorch forward semantics.

if __name__ == "__main__":
    key = jax.random.PRNGKey(0)
    B, Cin, Cout = 8, 32, 64

    k_x, k_w, k_b = jax.random.split(key, 3)
    x = jax.random.normal(k_x, (B, Cin), dtype=jnp.float32)

    # PyTorch-like uniform init for nn.Linear.
    bound = 1.0 / jnp.sqrt(jnp.float32(Cin))
    w = jax.random.uniform(k_w, (Cout, Cin), minval=-bound, maxval=bound,
                           dtype=jnp.float32)      # nn.Linear weight [Cout, Cin]
    b = jax.random.uniform(k_b, (Cout,), minval=-bound, maxval=bound,
                           dtype=jnp.float32)      # nn.Linear bias
    gamma = jnp.ones((Cout,), dtype=jnp.float32)   # BatchNorm1d weight
    beta = jnp.zeros((Cout,), dtype=jnp.float32)   # BatchNorm1d bias

    ref = _reference(x, w, b, gamma, beta)

    # f32 MXU path: tight check.
    out_f32 = linear_block_forward(x, w, b, gamma, beta,
                                   compute_dtype=jnp.float32)
    out_f32 = jax.block_until_ready(out_f32)
    assert out_f32.shape == (B, Cout)
    assert jnp.allclose(out_f32, ref, atol=1e-4, rtol=1e-4), "f32 mismatch vs reference"

    # bf16 MXU path (default, perf-oriented): looser check.
    out_bf16 = linear_block_forward(x, w, b, gamma, beta)
    out_bf16 = jax.block_until_ready(out_bf16)
    assert out_bf16.shape == (B, Cout)
    assert jnp.allclose(out_bf16, ref, atol=3e-2, rtol=3e-2), "bf16 mismatch vs reference"

    print("KERNEL_OK")
</pallas_src>

<mosaic_0001>
module attributes {stable_mosaic.version = 11 : i64} {
  func.func @_linear_bn_relu_kernel(%arg0: i32, %arg1: i32, %arg2: memref<16x128xf32, #tpu.memory_space<vmem>>, %arg3: memref<128x128xf32, #tpu.memory_space<vmem>>, %arg4: memref<1x128xf32, #tpu.memory_space<vmem>>, %arg5: memref<1x128xf32, #tpu.memory_space<vmem>>, %arg6: memref<1x128xf32, #tpu.memory_space<vmem>>, %arg7: memref<16x128xf32, #tpu.memory_space<vmem>>) attributes {dimension_semantics = [#tpu.dimension_semantics<parallel>, #tpu.dimension_semantics<arbitrary>], iteration_bounds = array<i64: 1, 1>, scalar_prefetch = 0 : i64, scratch_operands = 0 : i64, tpu.core_type = #tpu.core_type<tc>, window_params = [{pipeline_mode = #tpu.pipeline_mode<synchronous>, transform_indices = @transform_0, window_bounds = array<i64: 16, 128>}, {transform_indices = @transform_1, window_bounds = array<i64: 128, 128>}, {transform_indices = @transform_2, window_bounds = array<i64: 1, 128>}, {transform_indices = @transform_3, window_bounds = array<i64: 1, 128>}, {transform_indices = @transform_4, window_bounds = array<i64: 1, 128>}, {transform_indices = @transform_5, window_bounds = array<i64: 16, 128>}]} {
    %c0_i32 = arith.constant 0 : i32
    %0 = arith.cmpi eq, %arg1, %c0_i32 : i32
    %1 = arith.extui %0 : i1 to i32
    %c0_i32_0 = arith.constant 0 : i32
    %2 = arith.cmpi ne, %1, %c0_i32_0 : i32
    scf.if %2 {
      %cst_9 = arith.constant 0.000000e+00 : f32
      %15 = vector.broadcast %cst_9 : f32 to vector<16x128xf32>
      %c0_10 = arith.constant 0 : index
      %c0_11 = arith.constant 0 : index
      %16 = vector.load %arg7[%c0_10, %c0_11] : memref<16x128xf32, #tpu.memory_space<vmem>>, vector<16x128xf32>
      tpu.vector_store %arg7[%c0_10, %c0_11], %15 {strides = array<i32>} : memref<16x128xf32, #tpu.memory_space<vmem>>, vector<16x128xf32>,
    } else {
    }
    %c128_i32 = arith.constant 128 : i32
    %3 = arith.muli %arg1, %c128_i32 : i32
    %4 = tpu.assume_multiple %3, 128 : i32
    %c0 = arith.constant 0 : index
    %5 = arith.index_cast %4 : i32 to index
    %6 = vector.load %arg2[%c0, %5] : memref<16x128xf32, #tpu.memory_space<vmem>>, vector<16x128xf32>
    %c0_1 = arith.constant 0 : index
    %c0_2 = arith.constant 0 : index
    %7 = vector.load %arg7[%c0_1, %c0_2] : memref<16x128xf32, #tpu.memory_space<vmem>>, vector<16x128xf32>
    %c0_3 = arith.constant 0 : index
    %c0_4 = arith.constant 0 : index
    %8 = vector.load %arg3[%c0_3, %c0_4] : memref<128x128xf32, #tpu.memory_space<vmem>>, vector<128x128xf32>
    %cst = arith.constant dense<0.000000e+00> : vector<16x128xf32>
    %9 = tpu.matmul %6, %8, %cst {dimension_numbers = #tpu.dot_dimension_numbers<[1], [0], [0], [1], [0, 0, 1, 1], [], []>} : vector<16x128xf32>, vector<128x128xf32>, vector<16x128xf32> -> vector<16x128xf32>
    %10 = arith.addf %7, %9 : vector<16x128xf32>
    %c0_5 = arith.constant 0 : index
    %c0_6 = arith.constant 0 : index
    %11 = vector.load %arg7[%c0_5, %c0_6] : memref<16x128xf32, #tpu.memory_space<vmem>>, vector<16x128xf32>
    tpu.vector_store %arg7[%c0_5, %c0_6], %10 {strides = array<i32>} : memref<16x128xf32, #tpu.memory_space<vmem>>, vector<16x128xf32>,
    %c0_i32_7 = arith.constant 0 : i32
    %12 = arith.cmpi eq, %arg1, %c0_i32_7 : i32
    %13 = arith.extui %12 : i1 to i32
    %c0_i32_8 = arith.constant 0 : i32
    %14 = arith.cmpi ne, %13, %c0_i32_8 : i32
    scf.if %14 {
      %c0_9 = arith.constant 0 : index
      %c0_10 = arith.constant 0 : index
      %15 = vector.load %arg7[%c0_9, %c0_10] : memref<16x128xf32, #tpu.memory_space<vmem>>, vector<16x128xf32>
      %c0_11 = arith.constant 0 : index
      %c0_12 = arith.constant 0 : index
      %16 = vector.load %arg4[%c0_11, %c0_12] : memref<1x128xf32, #tpu.memory_space<vmem>>, vector<1x128xf32>
      %17 = vector.broadcast %16 : vector<1x128xf32> to vector<16x128xf32>
      %18 = arith.addf %15, %17 : vector<16x128xf32>
      %19 = tpu.iota {dimensions = array<i32: 0>} : vector<16x1xi32>
      %c8_i32 = arith.constant 8 : i32
      %20 = vector.broadcast %c8_i32 : i32 to vector<16x1xi32>
      %21 = arith.cmpi slt, %19, %20 : vector<16x1xi32>
      %cst_13 = arith.constant 0.000000e+00 : f32
      %22 = vector.shape_cast %21 : vector<16x1xi1> to vector<16x1xi1>
      %23 = vector.broadcast %22 : vector<16x1xi1> to vector<16x128xi1>
      %24 = vector.broadcast %cst_13 : f32 to vector<16x128xf32>
      %25 = arith.select %23, %18, %24 : vector<16x128xi1>, vector<16x128xf32>
      %cst_14 = arith.constant dense<0.000000e+00> : vector<128xf32>
      %26 = vector.multi_reduction <add>, %25, %cst_14 [0] : vector<16x128xf32> to vector<128xf32>
      %27 = vector.shape_cast %26 : vector<128xf32> to vector<1x128xf32>
      %cst_15 = arith.constant 1.250000e-01 : f32
      %28 = vector.broadcast %cst_15 : f32 to vector<1x128xf32>
      %29 = arith.mulf %27, %28 : vector<1x128xf32>
      %30 = vector.broadcast %29 : vector<1x128xf32> to vector<16x128xf32>
      %31 = arith.subf %18, %30 : vector<16x128xf32>
      %cst_16 = arith.constant 0.000000e+00 : f32
      %32 = vector.shape_cast %21 : vector<16x1xi1> to vector<16x1xi1>
      %33 = vector.broadcast %32 : vector<16x1xi1> to vector<16x128xi1>
      %34 = vector.broadcast %cst_16 : f32 to vector<16x128xf32>
      %35 = arith.select %33, %31, %34 : vector<16x128xi1>, vector<16x128xf32>
      %36 = arith.mulf %35, %35 : vector<16x128xf32>
      %cst_17 = arith.constant dense<0.000000e+00> : vector<128xf32>
      %37 = vector.multi_reduction <add>, %36, %cst_17 [0] : vector<16x128xf32> to vector<128xf32>
      %38 = vector.shape_cast %37 : vector<128xf32> to vector<1x128xf32>
      %cst_18 = arith.constant 1.250000e-01 : f32
      %39 = vector.broadcast %cst_18 : f32 to vector<1x128xf32>
      %40 = arith.mulf %38, %39 : vector<1x128xf32>
      %c0_19 = arith.constant 0 : index
      %c0_20 = arith.constant 0 : index
      %41 = vector.load %arg5[%c0_19, %c0_20] : memref<1x128xf32, #tpu.memory_space<vmem>>, vector<1x128xf32>
      %cst_21 = arith.constant 9.99999974E-6 : f32
      %42 = vector.broadcast %cst_21 : f32 to vector<1x128xf32>
      %43 = arith.addf %40, %42 : vector<1x128xf32>
      %44 = math.rsqrt %43 : vector<1x128xf32>
      %45 = arith.mulf %41, %44 : vector<1x128xf32>
      %c0_22 = arith.constant 0 : index
      %c0_23 = arith.constant 0 : index
      %46 = vector.load %arg6[%c0_22, %c0_23] : memref<1x128xf32, #tpu.memory_space<vmem>>, vector<1x128xf32>
      %47 = arith.mulf %29, %45 : vector<1x128xf32>
      %48 = arith.subf %46, %47 : vector<1x128xf32>
      %49 = vector.broadcast %45 : vector<1x128xf32> to vector<16x128xf32>
      %50 = arith.mulf %18, %49 : vector<16x128xf32>
      %51 = vector.broadcast %48 : vector<1x128xf32> to vector<16x128xf32>
      %52 = arith.addf %50, %51 : vector<16x128xf32>
      %cst_24 = arith.constant 0.000000e+00 : f32
      %53 = vector.broadcast %cst_24 : f32 to vector<16x128xf32>
      %54 = arith.maximumf %52, %53 : vector<16x128xf32>
      %c0_25 = arith.constant 0 : index
      %c0_26 = arith.constant 0 : index
      %55 = vector.load %arg7[%c0_25, %c0_26] : memref<16x128xf32, #tpu.memory_space<vmem>>, vector<16x128xf32>
      tpu.vector_store %arg7[%c0_25, %c0_26], %54 {strides = array<i32>} : memref<16x128xf32, #tpu.memory_space<vmem>>, vector<16x128xf32>,
    } else {
    }
    return
  }
  func.func @transform_0(%arg0: i32, %arg1: i32) -> (i32, i32) {
    %c0_i32 = arith.constant 0 : i32
    %c0_i32_0 = arith.constant 0 : i32
    %c0_i32_1 = arith.constant 0 : i32
    return %c0_i32, %c0_i32_0 : i32, i32
  }
  func.func @transform_1(%arg0: i32, %arg1: i32) -> (i32, i32) {
    %c0_i32 = arith.constant 0 : i32
    return %arg1, %arg0 : i32, i32
  }
  func.func @transform_2(%arg0: i32, %arg1: i32) -> (i32, i32) {
    %c0_i32 = arith.constant 0 : i32
    %c0_i32_0 = arith.constant 0 : i32
    return %c0_i32, %arg0 : i32, i32
  }
  func.func @transform_3(%arg0: i32, %arg1: i32) -> (i32, i32) {
    %c0_i32 = arith.constant 0 : i32
    %c0_i32_0 = arith.constant 0 : i32
    return %c0_i32, %arg0 : i32, i32
  }
  func.func @transform_4(%arg0: i32, %arg1: i32) -> (i32, i32) {
    %c0_i32 = arith.constant 0 : i32
    %c0_i32_0 = arith.constant 0 : i32
    return %c0_i32, %arg0 : i32, i32
  }
  func.func @transform_5(%arg0: i32, %arg1: i32) -> (i32, i32) {
    %c0_i32 = arith.constant 0 : i32
    %c0_i32_0 = arith.constant 0 : i32
    return %c0_i32, %arg0 : i32, i32
  }
}

</mosaic_0001>

<bundles_post_ra>
// kernel: tpu_custom_call.1
= control target key start
LH: loop header
LB: loop body
LE: loop exit
PB: predicated region body
PF: predicated region fallthrough
CT: control target
= control target key end

     0   :  { %10 = vsyncpa [#allocation3], 0  ;;  %s370_s0 = inlined_call_operand.hbm [shape: f32[16,128], index: 0, kind: input, shape index: {}]   ;;  %s371_s1 = inlined_call_operand.hbm [shape: f32[128,128], index: 1, kind: input, shape index: {}]   ;;  %s372_s2 = inlined_call_operand.vmem [shape: f32[1,128], index: 2, kind: input, shape index: {}]   ;;  %s373_s3 = inlined_call_operand.vmem [shape: f32[1,128], index: 3, kind: input, shape index: {}]   ;;  %s374_s4 = inlined_call_operand.vmem [shape: f32[1,128], index: 4, kind: input, shape index: {}]   ;;  %s375_s5 = inlined_call_operand.hbm [shape: f32[16,128], index: 5, kind: output, shape index: {}]  }
   0x1   :  { %11 = vsyncpa [#allocation6], 0 }
   0x2   :  { %12 = vsyncpa [#allocation4], 0  ;;  %s17_s20 = sshll.u32 %s370_s0, 4  ;;  %s308_s21 = smov [#allocation2]   ;;  %s18_s20 = int_to_ptr.hbm [resolvable:$true] %s17_s20 }
   0x3   :  { %s19_s22 = sshll.u32 %s308_s21, 4  ;;  %s30_s25 = sshll.u32 %s371_s1, 4  ;;  %s20_s22 = int_to_ptr.vmem [resolvable:$true] %s19_s22  ;;  %s31_s25 = int_to_ptr.hbm [resolvable:$true] %s30_s25 }
   0x4   :  { %s309_s26 = smov 128   ;;  %s310_s27 = smov 8  }
   0x5   :  { %25 = dma.hbm_to_vmem [thread:$0]  %s18_s20, 256, %s20_s22, [#allocation3], %s309_s26, %s309_s26, %s310_s27  }
   0x6   :  { %s311_s28 = smov [#allocation5]  }
   0x7   :  { %s32_s29 = sshll.u32 %s311_s28, 4  ;;  %s33_s29 = int_to_ptr.vmem [resolvable:$true] %s32_s29 }
   0x8   :  { %38 = dma.hbm_to_vmem [thread:$0]  %s31_s25, 2048, %s33_s29, [#allocation6], %s309_s26, %s309_s26, %s310_s27  }
   0x9   :  { %302 = dma.done.wait [#allocation3], 256  }
   0xa   :  { %303 = vsyncadd [#allocation3], 4294967040 }
   0xb   :  { %304 = dma.done.wait [#allocation6], 2048  }
   0xc   :  { %305 = vsyncadd [#allocation6], 4294965248  ;;  %v82_v0 = vld [vmem:[#allocation5 + $0x78] sm:$0xff]  ;;  %v81_v1 = vld [vmem:[#allocation5 + $0x70] sm:$0xff]  ;;  %s312_s8 = smov [#allocation7]   ;;  %s190_s11 = sshll.u32 %s375_s5, 4  ;;  %s191_s11 = int_to_ptr.hbm [resolvable:$true] %s190_s11 }
   0xd   :  { %83 = vmatpush.msra.mxu0 %v82_v0  ;;  %205 = vmatpush.msra.mxu1 %v82_v0  ;;  %v80_v2 = vld [vmem:[#allocation5 + $0x68] sm:$0xff]  ;;  %v79_v3 = vld [vmem:[#allocation5 + $0x60] sm:$0xff]  ;;  %v78_v4 = vld [vmem:[#allocation5 + $0x58] sm:$0xff] }
   0xe   :  { %v77_v5 = vld [vmem:[#allocation5 + $0x50] sm:$0xff]  ;;  %v76_v6 = vld [vmem:[#allocation5 + $0x48] sm:$0xff]  ;;  %v75_v7 = vld [vmem:[#allocation5 + $0x40] sm:$0xff] }
   0xf   :  { %84 = vmatpush.msra.mxu0 %v81_v1  ;;  %206 = vmatpush.msra.mxu1 %v81_v1  ;;  %v74_v8 = vld [vmem:[#allocation5 + $0x38] sm:$0xff]  ;;  %v73_v9 = vld [vmem:[#allocation5 + $0x30] sm:$0xff]  ;;  %v72_v10 = vld [vmem:[#allocation5 + $0x28] sm:$0xff] }
  0x10   :  { %v71_v11 = vld [vmem:[#allocation5 + $0x20] sm:$0xff]  ;;  %v70_v12 = vld [vmem:[#allocation5 + $0x18] sm:$0xff]  ;;  %v69_v13 = vld [vmem:[#allocation5 + $0x10] sm:$0xff] }
  0x11   :  { %85 = vmatpush.msra.mxu0 %v80_v2  ;;  %207 = vmatpush.msra.mxu1 %v80_v2  ;;  %v68_v14 = vld [vmem:[#allocation5 + $0x8] sm:$0xff]  ;;  %v67_v15 = vld [vmem:[#allocation5] sm:$0xff]  ;;  %v63_v16 = vld [vmem:[#allocation2] sm:$0xff] }
  0x12   :  { %v64_v17 = vld [vmem:[#allocation2 + $0x8] sm:$0xff]  ;;  %v227_v18 = vld [vmem:[%s372_s2] ss:$0 sm:$0xff] }
  0x13   :  { %86 = vmatpush.msra.mxu0 %v79_v3  ;;  %208 = vmatpush.msra.mxu1 %v79_v3  ;;  %v154_v44 = vld [vmem:[%s373_s3] sm:$0x1]  ;;  %s188_s3 = sshll.u32 %s312_s8, 4  ;;  %s189_s3 = int_to_ptr.vmem [resolvable:$true] %s188_s3 }
  0x14   :  { %v167_v48 = vld [vmem:[%s374_s4] sm:$0x1] }
  0x15   :  { %87 = vmatpush.msra.mxu0 %v78_v4  ;;  %209 = vmatpush.msra.mxu1 %v78_v4 }
  0x17   :  { %88 = vmatpush.msra.mxu0 %v77_v5  ;;  %210 = vmatpush.msra.mxu1 %v77_v5 }
  0x19   :  { %89 = vmatpush.msra.mxu0 %v76_v6  ;;  %211 = vmatpush.msra.mxu1 %v76_v6 }
  0x1b   :  { %90 = vmatpush.msra.mxu0 %v75_v7  ;;  %212 = vmatpush.msra.mxu1 %v75_v7 }
  0x1d   :  { %91 = vmatpush.msra.mxu0 %v74_v8  ;;  %213 = vmatpush.msra.mxu1 %v74_v8 }
  0x1f   :  { %92 = vmatpush.msra.mxu0 %v73_v9  ;;  %214 = vmatpush.msra.mxu1 %v73_v9 }
  0x21   :  { %93 = vmatpush.msra.mxu0 %v72_v10  ;;  %215 = vmatpush.msra.mxu1 %v72_v10 }
  0x23   :  { %94 = vmatpush.msra.mxu0 %v71_v11  ;;  %216 = vmatpush.msra.mxu1 %v71_v11 }
  0x25   :  { %95 = vmatpush.msra.mxu0 %v70_v12  ;;  %217 = vmatpush.msra.mxu1 %v70_v12 }
  0x27   :  { %96 = vmatpush.msra.mxu0 %v69_v13  ;;  %218 = vmatpush.msra.mxu1 %v69_v13 }
  0x29   :  { %97 = vmatpush.msra.mxu0 %v68_v14  ;;  %219 = vmatpush.msra.mxu1 %v68_v14 }
  0x2b   :  { %98 = vmatpush.msra.mxu0 %v67_v15  ;;  %220 = vmatpush.msra.mxu1 %v67_v15 }
  0x2c   :  { %99 = vmatmul.f32.vlgmr.msra.gmra.mxu0 %v63_v16  ;;  %102 = vmatmul.f32.vlgmr.msra.gmra.mxu1 %v64_v17 }
  0xa9   :  { %v100_v19 = vpop.f32.mrf.mxu0  ;;  %v103_v42 = vpop.f32.mrf.mxu1 }
  0xaa   :  { %v119_v20 = vadd.f32 %v227_v18, %v100_v19  ;;  %v120_v49 = vadd.f32 %v227_v18, %v103_v42 }
  0xac   :  { %v133_v21 = vrot.slane %v119_v20, 4 }
  0xae   :  { %v134_v22 = vadd.f32 %v133_v21, %v119_v20 }
  0xb0   :  { %v135_v23 = vrot.slane %v134_v22, 2 }
  0xb2   :  { %v136_v24 = vadd.f32 %v135_v23, %v134_v22 }
  0xb4   :  { %v137_v25 = vrot.slane %v136_v24, 1 }
  0xb6   :  { %v138_v26 = vadd.f32 %v137_v25, %v136_v24 }
  0xb8   :  { %v139_v27 = vmul.f32 0.125, %v138_v26 }
  0xba   :  { %v140_v28 = vsub.f32 %v119_v20, %v139_v27 }
  0xbc   :  { %v144_v29 = vmul.f32 %v140_v28, %v140_v28 }
  0xbe   :  { %v147_v30 = vrot.slane %v144_v29, 4 }
  0xc0   :  { %v148_v31 = vadd.f32 %v147_v30, %v144_v29 }
  0xc2   :  { %v149_v32 = vrot.slane %v148_v31, 2 }
  0xc4   :  { %v150_v33 = vadd.f32 %v149_v32, %v148_v31 }
  0xc6   :  { %v151_v34 = vrot.slane %v150_v33, 1 }
  0xc8   :  { %v152_v35 = vadd.f32 %v151_v34, %v150_v33 }
  0xca   :  { %v153_v36 = vmul.f32 0.125, %v152_v35 }
  0xcc   :  { %v155_v37 = vadd.f32 1e-05, %v153_v36 }
  0xce   :  { %228 = vrsqrt.f32 %v155_v37  ;;  %vm162_vm1 = vweird.f32 %v155_v37 }
  0xd4   :  { %v229_v38 = vpop.eup %228 }
  0xd5   :  { %v157_v39 = vmul.f32 %v229_v38, %v155_v37  ;;  %vm163_vm0 = vweird.f32 %v229_v38 }
  0xd6   :  { %vm164_vm2 = vmor %vm162_vm1, %vm163_vm0 }
  0xd7   :  { %v158_v40 = vmul.f32 %v229_v38, %v157_v39 }
  0xd9   :  { %v159_v41 = vmul.f32 0.5, %v158_v40 }
  0xdb   :  { %v160_v43 = vsub.f32 1.5, %v159_v41 }
  0xdd   :  { %v161_v45 = vmul.f32 %v229_v38, %v160_v43 }
  0xdf   :  { %v165_v46 = vsel %vm164_vm2, %v229_v38, %v161_v45 }
  0xe0   :  { %v166_v47 = vmul.f32 %v165_v46, %v154_v44 }
  0xe2   :  { %v168_v50 = vmul.f32 %v166_v47, %v139_v27  ;;  %v171_v51 = vperm.slane %v166_v47, 0 }
  0xe4   :  { %v169_v52 = vsub.f32 %v167_v48, %v168_v50  ;;  %v173_v53 = vmul.f32 %v171_v51, %v119_v20  ;;  %v174_v54 = vmul.f32 %v171_v51, %v120_v49 }
  0xe6   :  { %v176_v55 = vperm.slane %v169_v52, 0 }
  0xe8   :  { %v178_v56 = vadd.f32 %v176_v55, %v173_v53  ;;  %v179_v57 = vadd.f32 %v176_v55, %v174_v54 }
  0xea   :  { %v180_v58 = vmax.f32 %v178_v56, 0.0  ;;  %v181_v59 = vmax.f32 %v179_v57, 0.0 }
  0xec   :  { %182 = vst [vmem:[#allocation7] sm:$0xff] %v180_v58 }
  0xed   :  { %183 = vst [vmem:[#allocation7 + $0x8] sm:$0xff] %v181_v59 }
  0xee   :  { %196 = dma.vmem_to_hbm [thread:$0]  %s189_s3, 256, %s191_s11, [#allocation4], %s309_s26, %s309_s26, %s310_s27  }
  0xef   :  { %306 = dma.done.wait [#allocation4], 256  }
  0xf0   :  { %307 = vsyncadd [#allocation4], 4294967040 }
  0xf1   :  { %201 = vsyncpa [#allocation3], 1 }
  0xf2   :  { %202 = vsyncpa [#allocation6], 1 }
  0xf3   :  { %203 = vsyncpa [#allocation4], 1 }

</bundles_post_ra>
